<compile_context>
chip_gen: v6e
topology: v6e:2x2x1
jax: 0.10.0
libtpu: 0.0.40
codegen_flags: <defaults>
</compile_context>

<pallas_src>
import jax
import jax.numpy as jnp
from jax.experimental import pallas as pl
from jax.experimental.pallas import tpu as pltpu


def _round_up(x, m):
    return ((x + m - 1) // m) * m


def ffn_kernel(x_ref, w1_ref, b1_ref, w2_ref, b2_ref, o_ref, acc_ref):
    # x_ref:  (tm, D)  f32   row tile (constant across the reduction axis)
    # w1_ref: (D, th)  bf16  hidden-dim tile of W1
    # b1_ref: (1, th)  f32
    # w2_ref: (th, D)  bf16  hidden-dim tile of W2
    # b2_ref: (1, D)   f32
    # o_ref:  (tm, D)        output row tile (accumulated across k)
    # acc_ref:(tm, D)  f32   VMEM scratch accumulator
    k = pl.program_id(1)

    @pl.when(k == 0)
    def _():
        acc_ref[...] = jnp.zeros_like(acc_ref)

    # FFN_1 partial: hidden tile = relu(x @ W1[:, k*th:(k+1)*th] + b1[...]) in f32.
    h = jnp.dot(x_ref[...].astype(jnp.bfloat16), w1_ref[...],
                preferred_element_type=jnp.float32)
    h = jnp.maximum(h + b1_ref[...], 0.0)

    # FFN_2 partial: contract the hidden tile into the (tm, D) accumulator.
    acc_ref[...] += jnp.dot(h.astype(jnp.bfloat16), w2_ref[...],
                            preferred_element_type=jnp.float32)

    @pl.when(k == pl.num_programs(1) - 1)
    def _():
        o_ref[...] = (acc_ref[...] + b2_ref[...]).astype(o_ref.dtype)


def position_wise_feed_forward(x, w1, b1, w2, b2, *, tm=256, th=512,
                               vmem_limit_bytes=48 << 20):
    """x: (B, S, D) float32; w1: (D, 4D); b1: (4D,); w2: (4D, D); b2: (D,)."""
    B, S, D = x.shape
    H = w1.shape[1]  # 4*D
    M = B * S

    # Clamp tiles for small problems (block dims must be full-extent or
    # multiples of (8, 128)).
    tm = min(tm, _round_up(M, 8))
    th = min(th, H)
    if H % th != 0:
        th = H  # fall back to an untiled hidden dim for awkward sizes

    # Pad the row count up to a multiple of the row tile; sliced off at the end.
    Mp = _round_up(M, tm)
    x2d = x.reshape(M, D)
    if Mp != M:
        x2d = jnp.pad(x2d, ((0, Mp - M), (0, 0)))

    # bf16 weights: halves weight DMA bytes / VMEM; MXU still accumulates in f32.
    w1_bf = w1.astype(jnp.bfloat16)
    w2_bf = w2.astype(jnp.bfloat16)
    b1_2d = b1.reshape(1, H).astype(jnp.float32)
    b2_2d = b2.reshape(1, D).astype(jnp.float32)

    grid = (Mp // tm, H // th)

    out2d = pl.pallas_call(
        ffn_kernel,
        out_shape=jax.ShapeDtypeStruct((Mp, D), x.dtype),
        grid=grid,
        in_specs=[
            pl.BlockSpec((tm, D), lambda i, k: (i, 0)),   # x row tile
            pl.BlockSpec((D, th), lambda i, k: (0, k)),   # W1 hidden tile
            pl.BlockSpec((1, th), lambda i, k: (0, k)),   # b1 hidden tile
            pl.BlockSpec((th, D), lambda i, k: (k, 0)),   # W2 hidden tile
            pl.BlockSpec((1, D), lambda i, k: (0, 0)),    # b2 (resident)
        ],
        out_specs=pl.BlockSpec((tm, D), lambda i, k: (i, 0)),
        scratch_shapes=[pltpu.VMEM((tm, D), jnp.float32)],
        compiler_params=pltpu.CompilerParams(
            dimension_semantics=("parallel", "arbitrary"),
            vmem_limit_bytes=vmem_limit_bytes,
        ),
    )(x2d, w1_bf, b1_2d, w2_bf, b2_2d)

    return out2d[:M].reshape(B, S, D)


def init_params(key, emb_dim):
    """Deterministic init matching nn.Linear shapes (kaiming-uniform-like bounds)."""
    hidden = emb_dim * 4
    k1, k2, k3, k4 = jax.random.split(key, 4)
    bound1 = 1.0 / (emb_dim ** 0.5)
    bound2 = 1.0 / (hidden ** 0.5)
    w1 = jax.random.uniform(k1, (emb_dim, hidden), jnp.float32, -bound1, bound1)
    b1 = jax.random.uniform(k2, (hidden,), jnp.float32, -bound1, bound1)
    w2 = jax.random.uniform(k3, (hidden, emb_dim), jnp.float32, -bound2, bound2)
    b2 = jax.random.uniform(k4, (emb_dim,), jnp.float32, -bound2, bound2)
    return w1, b1, w2, b2


def ffn_reference(x, w1, b1, w2, b2):
    return jnp.maximum(x @ w1 + b1, 0.0) @ w2 + b2


if __name__ == "__main__":
    key = jax.random.PRNGKey(0)
    k_x, k_p, k_x2, k_p2 = jax.random.split(key, 4)

    # Small shapes consistent with the module.
    batch, seq, emb_dim = 2, 8, 32
    x = jax.random.normal(k_x, (batch, seq, emb_dim), dtype=jnp.float32)
    w1, b1, w2, b2 = init_params(k_p, emb_dim)

    out = position_wise_feed_forward(x, w1, b1, w2, b2)
    out = jax.block_until_ready(out)
    ref = ffn_reference(x, w1, b1, w2, b2)
    assert out.shape == (batch, seq, emb_dim)
    # bf16 matmul operands with f32 accumulation -> loosen tolerance vs f32 ref.
    assert jnp.allclose(out, ref, atol=2e-2, rtol=2e-2), \
        float(jnp.max(jnp.abs(out - ref)))

    # Second case that exercises row tiling + row padding + the hidden-dim
    # reduction axis (grid = (2, 2)).
    batch2, seq2, dim2 = 2, 72, 256     # M = 144 -> padded to 256; H = 1024 -> 2 k-steps
    x_l = jax.random.normal(k_x2, (batch2, seq2, dim2), dtype=jnp.float32)
    w1_l, b1_l, w2_l, b2_l = init_params(k_p2, dim2)
    out_l = position_wise_feed_forward(x_l, w1_l, b1_l, w2_l, b2_l, tm=128, th=512)
    out_l = jax.block_until_ready(out_l)
    ref_l = ffn_reference(x_l, w1_l, b1_l, w2_l, b2_l)
    assert out_l.shape == (batch2, seq2, dim2)
    assert jnp.allclose(out_l, ref_l, atol=2e-2, rtol=2e-2), \
        float(jnp.max(jnp.abs(out_l - ref_l)))

    print("KERNEL_OK")
</pallas_src>

<mosaic_0001>
module attributes {stable_mosaic.version = 11 : i64} {
  func.func @ffn_kernel(%arg0: i32, %arg1: i32, %arg2: memref<16x32xf32, #tpu.memory_space<vmem>>, %arg3: memref<32x128xbf16, #tpu.memory_space<vmem>>, %arg4: memref<1x128xf32, #tpu.memory_space<vmem>>, %arg5: memref<128x32xbf16, #tpu.memory_space<vmem>>, %arg6: memref<1x32xf32, #tpu.memory_space<vmem>>, %arg7: memref<16x32xf32, #tpu.memory_space<vmem>>, %arg8: memref<16x32xf32, #tpu.memory_space<vmem>>) attributes {dimension_semantics = [#tpu.dimension_semantics<parallel>, #tpu.dimension_semantics<arbitrary>], iteration_bounds = array<i64: 1, 1>, scalar_prefetch = 0 : i64, scratch_operands = 1 : i64, tpu.core_type = #tpu.core_type<tc>, window_params = [{transform_indices = @transform_0, window_bounds = array<i64: 16, 32>}, {transform_indices = @transform_1, window_bounds = array<i64: 32, 128>}, {transform_indices = @transform_2, window_bounds = array<i64: 1, 128>}, {transform_indices = @transform_3, window_bounds = array<i64: 128, 32>}, {pipeline_mode = #tpu.pipeline_mode<synchronous>, transform_indices = @transform_4, window_bounds = array<i64: 1, 32>}, {transform_indices = @transform_5, window_bounds = array<i64: 16, 32>}]} {
    %c0_i32 = arith.constant 0 : i32
    %0 = arith.cmpi eq, %arg1, %c0_i32 : i32
    %1 = arith.extui %0 : i1 to i32
    %c0_i32_0 = arith.constant 0 : i32
    %2 = arith.cmpi ne, %1, %c0_i32_0 : i32
    scf.if %2 {
      %cst_16 = arith.constant 0.000000e+00 : f32
      %21 = vector.broadcast %cst_16 : f32 to vector<16x32xf32>
      %c0_17 = arith.constant 0 : index
      %c0_18 = arith.constant 0 : index
      %22 = vector.load %arg8[%c0_17, %c0_18] : memref<16x32xf32, #tpu.memory_space<vmem>>, vector<16x32xf32>
      tpu.vector_store %arg8[%c0_17, %c0_18], %21 {strides = array<i32>} : memref<16x32xf32, #tpu.memory_space<vmem>>, vector<16x32xf32>,
    } else {
    }
    %c0 = arith.constant 0 : index
    %c0_1 = arith.constant 0 : index
    %3 = vector.load %arg2[%c0, %c0_1] : memref<16x32xf32, #tpu.memory_space<vmem>>, vector<16x32xf32>
    %4 = arith.truncf %3 : vector<16x32xf32> to vector<16x32xbf16>
    %c0_2 = arith.constant 0 : index
    %c0_3 = arith.constant 0 : index
    %5 = vector.load %arg3[%c0_2, %c0_3] : memref<32x128xbf16, #tpu.memory_space<vmem>>, vector<32x128xbf16>
    %cst = arith.constant dense<0.000000e+00> : vector<16x128xf32>
    %6 = tpu.matmul %4, %5, %cst {dimension_numbers = #tpu.dot_dimension_numbers<[1], [0], [0], [1], [0, 0, 1, 1], [], []>} : vector<16x32xbf16>, vector<32x128xbf16>, vector<16x128xf32> -> vector<16x128xf32>
    %c0_4 = arith.constant 0 : index
    %c0_5 = arith.constant 0 : index
    %7 = vector.load %arg4[%c0_4, %c0_5] : memref<1x128xf32, #tpu.memory_space<vmem>>, vector<1x128xf32>
    %8 = vector.broadcast %7 : vector<1x128xf32> to vector<16x128xf32>
    %9 = arith.addf %6, %8 : vector<16x128xf32>
    %cst_6 = arith.constant 0.000000e+00 : f32
    %10 = vector.broadcast %cst_6 : f32 to vector<16x128xf32>
    %11 = arith.maximumf %9, %10 : vector<16x128xf32>
    %c0_7 = arith.constant 0 : index
    %c0_8 = arith.constant 0 : index
    %12 = vector.load %arg8[%c0_7, %c0_8] : memref<16x32xf32, #tpu.memory_space<vmem>>, vector<16x32xf32>
    %13 = arith.truncf %11 : vector<16x128xf32> to vector<16x128xbf16>
    %c0_9 = arith.constant 0 : index
    %c0_10 = arith.constant 0 : index
    %14 = vector.load %arg5[%c0_9, %c0_10] : memref<128x32xbf16, #tpu.memory_space<vmem>>, vector<128x32xbf16>
    %cst_11 = arith.constant dense<0.000000e+00> : vector<16x32xf32>
    %15 = tpu.matmul %13, %14, %cst_11 {dimension_numbers = #tpu.dot_dimension_numbers<[1], [0], [0], [1], [0, 0, 1, 1], [], []>} : vector<16x128xbf16>, vector<128x32xbf16>, vector<16x32xf32> -> vector<16x32xf32>
    %16 = arith.addf %12, %15 : vector<16x32xf32>
    %c0_12 = arith.constant 0 : index
    %c0_13 = arith.constant 0 : index
    %17 = vector.load %arg8[%c0_12, %c0_13] : memref<16x32xf32, #tpu.memory_space<vmem>>, vector<16x32xf32>
    tpu.vector_store %arg8[%c0_12, %c0_13], %16 {strides = array<i32>} : memref<16x32xf32, #tpu.memory_space<vmem>>, vector<16x32xf32>,
    %c0_i32_14 = arith.constant 0 : i32
    %18 = arith.cmpi eq, %arg1, %c0_i32_14 : i32
    %19 = arith.extui %18 : i1 to i32
    %c0_i32_15 = arith.constant 0 : i32
    %20 = arith.cmpi ne, %19, %c0_i32_15 : i32
    scf.if %20 {
      %c0_16 = arith.constant 0 : index
      %c0_17 = arith.constant 0 : index
      %21 = vector.load %arg8[%c0_16, %c0_17] : memref<16x32xf32, #tpu.memory_space<vmem>>, vector<16x32xf32>
      %c0_18 = arith.constant 0 : index
      %c0_19 = arith.constant 0 : index
      %22 = vector.load %arg6[%c0_18, %c0_19] : memref<1x32xf32, #tpu.memory_space<vmem>>, vector<1x32xf32>
      %23 = vector.broadcast %22 : vector<1x32xf32> to vector<16x32xf32>
      %24 = arith.addf %21, %23 : vector<16x32xf32>
      %c0_20 = arith.constant 0 : index
      %c0_21 = arith.constant 0 : index
      %25 = vector.load %arg7[%c0_20, %c0_21] : memref<16x32xf32, #tpu.memory_space<vmem>>, vector<16x32xf32>
      tpu.vector_store %arg7[%c0_20, %c0_21], %24 {strides = array<i32>} : memref<16x32xf32, #tpu.memory_space<vmem>>, vector<16x32xf32>,
    } else {
    }
    return
  }
  func.func @transform_0(%arg0: i32, %arg1: i32) -> (i32, i32) {
    %c0_i32 = arith.constant 0 : i32
    %c0_i32_0 = arith.constant 0 : i32
    return %arg0, %c0_i32 : i32, i32
  }
  func.func @transform_1(%arg0: i32, %arg1: i32) -> (i32, i32) {
    %c0_i32 = arith.constant 0 : i32
    %c0_i32_0 = arith.constant 0 : i32
    return %c0_i32, %arg1 : i32, i32
  }
  func.func @transform_2(%arg0: i32, %arg1: i32) -> (i32, i32) {
    %c0_i32 = arith.constant 0 : i32
    %c0_i32_0 = arith.constant 0 : i32
    return %c0_i32, %arg1 : i32, i32
  }
  func.func @transform_3(%arg0: i32, %arg1: i32) -> (i32, i32) {
    %c0_i32 = arith.constant 0 : i32
    %c0_i32_0 = arith.constant 0 : i32
    return %arg1, %c0_i32 : i32, i32
  }
  func.func @transform_4(%arg0: i32, %arg1: i32) -> (i32, i32) {
    %c0_i32 = arith.constant 0 : i32
    %c0_i32_0 = arith.constant 0 : i32
    %c0_i32_1 = arith.constant 0 : i32
    return %c0_i32, %c0_i32_0 : i32, i32
  }
  func.func @transform_5(%arg0: i32, %arg1: i32) -> (i32, i32) {
    %c0_i32 = arith.constant 0 : i32
    %c0_i32_0 = arith.constant 0 : i32
    return %arg0, %c0_i32 : i32, i32
  }
}

</mosaic_0001>

<bundles_post_ra>
// kernel: tpu_custom_call.1
= control target key start
LH: loop header
LB: loop body
LE: loop exit
PB: predicated region body
PF: predicated region fallthrough
CT: control target
= control target key end

     0   :  { %v336_v1 = vmov 0.0   ;;  %vm337_vm0 = vmmov 0   ;;  %vm26_vm1 = vcmask 261120   ;;  %s423_s0 = inlined_call_operand.vmem [shape: f32[16,32], index: 0, kind: input, shape index: {}]   ;;  %s424_s1 = inlined_call_operand.vmem [shape: bf16[32,128], index: 1, kind: input, shape index: {}]   ;;  %s425_s2 = inlined_call_operand.vmem [shape: f32[1,128], index: 2, kind: input, shape index: {}]   ;;  %s426_s3 = inlined_call_operand.vmem [shape: bf16[128,32], index: 3, kind: input, shape index: {}]   ;;  %s427_s4 = inlined_call_operand.vmem [shape: f32[1,32], index: 4, kind: input, shape index: {}]   ;;  %s428_s5 = inlined_call_operand.hbm [shape: f32[16,32], index: 5, kind: output, shape index: {}]  }
   0x1   :  { %v304_v0 = vld [vmem:[%s424_s1 + $0x8] sm:$0xff]   ;;  %271 = vmatprep.subr.bf16.mxu0 %v336_v1  ;;  %v305_v2 = vld [vmem:[%s424_s1] sm:$0xff]   ;;  %279 = vmatprep.subr.bf16.mxu1 %v336_v1  ;;  %27 = vst.msk [vmem:[#allocation2] sm:$0xff] %vm26_vm1, %v336_v1  ;;  %28 = vst.msk [vmem:[#allocation2 + $0x8] sm:$0xff] %vm26_vm1, %v336_v1 }
   0x2   :  { %272 = vmatpush3.bf16.msra.mxu0 %v304_v0  ;;  %275 = vmatprep.mubr.msk.bf16.mxu0 %vm337_vm0, %v336_v1  ;;  %v29_v3 = vld [vmem:[%s423_s0] sm:$0xff]  ;;  %v30_v4 = vld [vmem:[%s423_s0 + $0x8] sm:$0xff]  ;;  %v306_v5 = vld [vmem:[%s426_s3 + $0x38] sm:$0xff]  }
   0x3   :  { %273 = vmatprep.subr.bf16.mxu0 %v336_v1  ;;  %295 = vmatprep.mubr.msk.bf16.mxu1 %vm337_vm0, %v336_v1  ;;  %v31_v6 = vpack.c.bf16 %v30_v4, %v29_v3  ;;  %v307_v7 = vld [vmem:[%s426_s3 + $0x30] sm:$0xff]   ;;  %v308_v8 = vld [vmem:[%s426_s3 + $0x28] sm:$0xff]  }
   0x4   :  { %280 = vmatpush3.bf16.msra.mxu1 %v306_v5 }
   0x5   :  { %281 = vmatprep.subr.bf16.mxu1 %v336_v1 }
   0x6   :  { %274 = vmatpush3.bf16.msra.mxu0 %v305_v2 }
   0x8   :  { %282 = vmatpush3.bf16.msra.mxu1 %v307_v7 }
   0x9   :  { %276 = vmatmul.mubr.msk.bf16.vlgmr.msra.gmra.mxu0 %vm26_vm1, %v31_v6  ;;  %283 = vmatprep.subr.bf16.mxu1 %v336_v1 }
   0xa   :  { %10 = vsyncpa [#allocation4], 0  ;;  %v309_v9 = vld [vmem:[%s426_s3 + $0x20] sm:$0xff]   ;;  %v310_v10 = vld [vmem:[%s426_s3 + $0x18] sm:$0xff]   ;;  %s338_s17 = smov [#allocation3]  }
   0xb   :  { %v311_v11 = vld [vmem:[%s426_s3 + $0x10] sm:$0xff]   ;;  %v312_v12 = vld [vmem:[%s426_s3 + $0x8] sm:$0xff]   ;;  %v313_v13 = vld [vmem:[%s426_s3] sm:$0xff]   ;;  %s235_s18 = sshll.u32 %s338_s17, 4  ;;  %s236_s18 = int_to_ptr.vmem [resolvable:$true] %s235_s18 }
   0xc   :  { %284 = vmatpush3.bf16.msra.mxu1 %v308_v8  ;;  %v246_v14 = vld [vmem:[%s425_s2] ss:$0 sm:$0xff]  ;;  %v103_v28 = vld [vmem:[#allocation2 + $0x8] sm:$0xff]  ;;  %s314_s19 = scalar_lea.vmem %s236_s18, 256  ;;  %p319_p1 = scmp.lt.s32.totalorder %s236_s18, %s236_s18 }
   0xd   :  { %285 = vmatprep.subr.bf16.mxu1 %v336_v1  ;;  %v102_v24 = vld [vmem:[#allocation2] sm:$0xff]  ;;  %p315_p0 = scmp.ne.s32.totalorder %s236_s18, %s314_s19  ;;  %p320_p2 = scmp.lt.s32.totalorder %s314_s19, %s314_s19 }
   0xe   :  { %v258_v32 = vld [vmem:[%s427_s4] ss:$0 sm:$0xff] }
   0xf   :  { %p321_p3 = por %p320_p2, %p319_p1 }
  0x10   :  { %286 = vmatpush3.bf16.msra.mxu1 %v309_v9 }
  0x11   :  { %287 = vmatprep.subr.bf16.mxu1 %v336_v1  ;;  %p322_p4 = pnand %p321_p3, %p315_p0 }
  0x14   :  { %288 = vmatpush3.bf16.msra.mxu1 %v310_v10 }
  0x15   :  { %289 = vmatprep.subr.bf16.mxu1 %v336_v1 }
  0x18   :  { %290 = vmatpush3.bf16.msra.mxu1 %v311_v11 }
  0x19   :  { %291 = vmatprep.subr.bf16.mxu1 %v336_v1 }
  0x1c   :  { %292 = vmatpush3.bf16.msra.mxu1 %v312_v12 }
  0x1d   :  { %293 = vmatprep.subr.bf16.mxu1 %v336_v1 }
  0x20   :  { %294 = vmatpush3.bf16.msra.mxu1 %v313_v13 }
  0xc9   :  { %v93_v15 = vpop.f32.mrf.mxu0 }
  0xca   :  { %v94_v17 = vadd.f32 %v246_v14, %v93_v15 }
  0xcb   :  { %v277_v16 = vpop.f32.mrf.mxu0 }
  0xcc   :  { %v100_v21 = vmax.f32 %v94_v17, 0.0 }
  0xcd   :  { %v96_v18 = vpop.f32.mrf.mxu0 }
  0xce   :  { %v97_v19 = vadd.f32 %v246_v14, %v96_v18 }
  0xcf   :  { %v278_v20 = vpop.f32.mrf.mxu0 }
  0xd0   :  { %v101_v22 = vmax.f32 %v97_v19, 0.0 }
  0xd2   :  { %v104_v23 = vpack.c.bf16 %v101_v22, %v100_v21 }
  0xd4   :  { %296 = vmatmul.mubr.bf16.vlgmr.msra.gmra.mxu1 %v104_v23 }
 0x194   :  { %v203_v25 = vpop.f32.mrf.mxu1 }
 0x195   :  { %v210_v26 = vadd.f32 %v203_v25, %v102_v24 }
 0x196   :  { %v297_v27 = vpop.f32.mrf.mxu1 }
 0x197   :  { %212 = vst.msk [vmem:[#allocation2] sm:$0xff] %vm26_vm1, %v210_v26 }
 0x198   :  { %v206_v29 = vpop.f32.mrf.mxu1 }
 0x199   :  { %v211_v30 = vadd.f32 %v206_v29, %v103_v28 }
 0x19a   :  { %v298_v31 = vpop.f32.mrf.mxu1 }
 0x19b   :  { %213 = vst.msk [vmem:[#allocation2 + $0x8] sm:$0xff] %vm26_vm1, %v211_v30 }
 0x19e   :  { %v217_v33 = vld [vmem:[#allocation2] sm:$0xff] }
 0x19f   :  { %v226_v34 = vadd.f32 %v258_v32, %v217_v33 }
 0x1a1   :  { %228 = vst.msk [vmem:[#allocation3] sm:$0xff] %vm26_vm1, %v226_v34 }
 0x1a2   :  { %v218_v35 = vld [vmem:[#allocation2 + $0x8] sm:$0xff] }
 0x1a3   :  { %v227_v36 = vadd.f32 %v258_v32, %v218_v35 }
 0x1a5   :  { %229 = vst.msk [vmem:[#allocation3 + $0x8] sm:$0xff] %vm26_vm1, %v227_v36 }
 0x1a6   :  { %325 = shalt.err (!%p322_p4)
}
 0x1a7   :  { %s339_s20 = smov 128   ;;  %s340_s4 = smov 8  }
 0x1a8   :  { %241 = dma.vmem_to_hbm [thread:$0]  %s236_s18, 256, %s428_s5, [#allocation4], %s339_s20, %s339_s20, %s340_s4  }
 0x1a9   :  { %334 = dma.done.wait [#allocation4], 256  }
 0x1aa   :  { %335 = vsyncadd [#allocation4], 4294967040 }
 0x1ab   :  { %245 = vsyncpa [#allocation4], 1 }

</bundles_post_ra>
